<compile_context>
chip_gen: v7x
topology: tpu7x:2x2x1
jax: 0.10.0
libtpu: 0.0.40
codegen_flags: <defaults>
</compile_context>

<pallas_src>
import numpy as np
import jax
import jax.numpy as jnp
from jax.experimental import pallas as pl
from jax.experimental.pallas import tpu as pltpu

_LANE = 128       # TPU lane width
_COUT_PAD = 128   # conv output channels padded to a lane-dense width
_K_PAD = 32       # 3*3*3 = 27 im2col taps padded to 32 on the contraction axis


def _cparams():
    return pltpu.CompilerParams(
        dimension_semantics=("parallel",),      # row tiles are independent
        vmem_limit_bytes=32 * 1024 * 1024,      # safe on v5e/v6e/v7x
    )


def _row_tile(n, cap):
    """Largest multiple-of-8 tile <= cap that evenly divides n (else full extent)."""
    t = min(cap, n)
    t -= t % 8
    while t >= 8:
        if n % t == 0:
            return t
        t -= 8
    return n  # single full-extent tile is always a legal BlockSpec


# ----------------------------------------------------------------------------
# Host helper: bilinear "resize then center-crop" interpolation matrix that
# matches cv.resize(INTER_LINEAR) + blobFromImage(crop=True) semantics.
# ----------------------------------------------------------------------------
def _resize_crop_matrix(src, dst_resized, dst_crop):
    off = int(0.5 * (dst_resized - dst_crop))
    rows = np.zeros((dst_crop, src), dtype=np.float32)
    scale = src / float(dst_resized)
    for i in range(dst_crop):
        sc = (i + off + 0.5) * scale - 0.5
        sc = min(max(sc, 0.0), src - 1.0)
        lo = int(np.floor(sc))
        hi = min(lo + 1, src - 1)
        w_hi = sc - lo
        rows[i, lo] += 1.0 - w_hi
        rows[i, hi] += w_hi
    return rows


# ----------------------------------------------------------------------------
# Kernel 1: blobFromImage hot path (row-tiled).
#   out[c, tile, :] = (wh_tile/255) @ img[c] @ Ww^T     (swapRB pre-applied)
# ----------------------------------------------------------------------------
def _blob_kernel(wh_ref, img_ref, wwt_ref, out_ref):
    # wh_ref : (THb, Hs)      height-interp rows for this tile (1/255 folded in)
    # img_ref: (Hs, 3*Wpad)   source image, channels side-by-side on the lane
    #                         axis, each segment zero-padded to a 128 multiple
    # wwt_ref: (Wpad, Wt)     width-interp matrix (transposed, zero-padded rows)
    # out_ref: (3, THb, Wt)   NCHW blob tile
    wpad = wwt_ref.shape[0]
    # One lane-dense MXU matmul performs the height resize for all 3 channels.
    rows = jnp.dot(wh_ref[...], img_ref[...],
                   preferred_element_type=jnp.float32)          # (THb, 3*Wpad)
    for c in range(3):  # static 3-iteration loop; lane slices are 128-aligned
        out_ref[c] = jnp.dot(rows[:, c * wpad:(c + 1) * wpad], wwt_ref[...],
                             preferred_element_type=jnp.float32)


def make_blob(x_hwc, size):
    """x_hwc: (H, W, 3) float32 in [0, 255]. size = (width, height).
    Returns an NCHW blob like cv.dnn.blobFromImage(..., swapRB=True, crop=True)."""
    Wt, Ht = size
    Hs, Ws, _ = x_hwc.shape
    f = max(Wt / Ws, Ht / Hs)                      # crop=True scale factor
    Hr, Wr = int(round(Hs * f)), int(round(Ws * f))

    # 1/255 folded into the height-interp matrix (removes a per-pixel VPU mul).
    wh = jnp.asarray(_resize_crop_matrix(Hs, Hr, Ht) * np.float32(1.0 / 255.0))
    ww = _resize_crop_matrix(Ws, Wr, Wt)
    wpad = ((Ws + _LANE - 1) // _LANE) * _LANE
    wwt = jnp.asarray(np.pad(ww.T, ((0, wpad - Ws), (0, 0))))    # (Wpad, Wt)

    # swapRB folded into the host layout; channels laid side-by-side on lanes.
    img = jnp.transpose(x_hwc[:, :, ::-1].astype(jnp.float32), (0, 2, 1))
    img = jnp.pad(img, ((0, 0), (0, 0), (0, wpad - Ws)))         # (Hs, 3, Wpad)
    img = img.reshape(Hs, 3 * wpad)

    thb = _row_tile(Ht, 64)
    blob = pl.pallas_call(
        _blob_kernel,
        out_shape=jax.ShapeDtypeStruct((3, Ht, Wt), jnp.float32),
        grid=(Ht // thb,),
        in_specs=[
            pl.BlockSpec((thb, Hs), lambda i: (i, 0)),
            pl.BlockSpec((Hs, 3 * wpad), lambda i: (0, 0)),   # stays resident
            pl.BlockSpec((wpad, Wt), lambda i: (0, 0)),
        ],
        out_specs=pl.BlockSpec((3, thb, Wt), lambda i: (0, i, 0)),
        compiler_params=_cparams(),
    )(wh, img, wwt)
    return blob[None]  # (1, 3, Ht, Wt)


# ----------------------------------------------------------------------------
# Kernel 2: YOLOv3 stem — 3x3 conv (pad 1, stride 1, 32 filters) + folded BN
# + LeakyReLU(0.1), as a single lane-dense im2col matmul per row tile.
# ----------------------------------------------------------------------------
def _conv_stem_kernel(p_ref, w_ref, b_ref, o_ref):
    # p_ref: (TH*Wt, 32) im2col patches     w_ref: (32, 128) BN-folded weights
    # b_ref: (1, 128) BN bias               o_ref: (TH*Wt, 128) lane-dense out
    y = jnp.dot(p_ref[...], w_ref[...], preferred_element_type=jnp.float32)
    y = y + b_ref[...]
    o_ref[...] = jnp.where(y > 0.0, y, 0.1 * y)   # LeakyReLU(0.1)


def conv_stem(blob_nchw, w_hwio, bn_scale, bn_bias):
    x = jnp.transpose(blob_nchw[0], (1, 2, 0))     # (Ht, Wt, 3) HWC
    Ht, Wt, Cin = x.shape
    Cout = w_hwio.shape[-1]
    kdim = 9 * Cin                                  # 27

    # im2col (space-to-depth of the 3x3 taps) done in the wrapper: one
    # (rows, 27->32) @ (32, 128) matmul replaces 9 tiny K=3 MXU pushes.
    xp = jnp.pad(x, ((1, 1), (1, 1), (0, 0)))
    taps = [xp[dy:dy + Ht, dx:dx + Wt, :] for dy in range(3) for dx in range(3)]
    patches = jnp.concatenate(taps, axis=-1).reshape(Ht * Wt, kdim)
    patches = jnp.pad(patches, ((0, 0), (0, _K_PAD - kdim)))

    # Fold the BatchNorm scale into the weights; pad Cout to 128 so the output
    # stores are lane-dense (unmasked vst) on every TPU generation.
    w_f = (w_hwio * bn_scale.reshape(1, 1, 1, Cout)).reshape(kdim, Cout)
    w_f = jnp.pad(w_f, ((0, _K_PAD - kdim), (0, _COUT_PAD - Cout)))
    b_f = jnp.pad(bn_bias.reshape(1, Cout), ((0, 0), (0, _COUT_PAD - Cout)))

    # 32 rows/tile keeps the double-buffered output (< 12 MiB/buf at 704-wide)
    # within the 32 MiB scoped-VMEM limit on every TPU generation.
    th = _row_tile(Ht, 32)
    out = pl.pallas_call(
        _conv_stem_kernel,
        out_shape=jax.ShapeDtypeStruct((Ht * Wt, _COUT_PAD), jnp.float32),
        grid=(Ht // th,),
        in_specs=[
            pl.BlockSpec((th * Wt, _K_PAD), lambda i: (i, 0)),
            pl.BlockSpec((_K_PAD, _COUT_PAD), lambda i: (0, 0)),
            pl.BlockSpec((1, _COUT_PAD), lambda i: (0, 0)),
        ],
        out_specs=pl.BlockSpec((th * Wt, _COUT_PAD), lambda i: (i, 0)),
        compiler_params=_cparams(),
    )(patches, w_f, b_f)

    return out[:, :Cout].reshape(1, Ht, Wt, Cout)   # (1, Ht, Wt, 32) NHWC


def dnn_forward(x_hwc, params, size=(16, 16)):
    """Mirrors DNN.forward: preprocess image -> run (stem of) the YOLO network."""
    blob = make_blob(x_hwc, size)
    feat = conv_stem(blob, params["w"], params["bn_scale"], params["bn_bias"])
    # TODO(synk): remaining Darknet layers / YOLO output heads omitted
    # (weights live in yolov3.weights which cannot be loaded here).
    return blob, feat


if __name__ == "__main__":
    key = jax.random.PRNGKey(0)
    k_img, k_w, k_s, k_b = jax.random.split(key, 4)

    # Small image consistent with the module's image input (H, W, 3 channels).
    H_in, W_in = 20, 24
    x = jax.random.uniform(k_img, (H_in, W_in, 3), jnp.float32, 0.0, 255.0)

    # Deterministic synthetic stem parameters (Darknet conv1: 32 filters, 3x3).
    params = {
        "w": jax.random.normal(k_w, (3, 3, 3, 32), jnp.float32) * 0.1,   # HWIO
        "bn_scale": jnp.abs(jax.random.normal(k_s, (32,), jnp.float32)) + 0.5,
        "bn_bias": jax.random.normal(k_b, (32,), jnp.float32) * 0.1,
    }

    # Module hardcodes size=(704, 640); scaled down to (16, 16) for the test.
    size = (16, 16)
    blob, feat = dnn_forward(x, params, size=size)
    jax.block_until_ready((blob, feat))
    assert blob.shape == (1, 3, 16, 16) and feat.shape == (1, 16, 16, 32)

    # --- pure-JAX reference check (independent conv path) -------------------
    Wt_t, Ht_t = size
    f = max(Wt_t / W_in, Ht_t / H_in)
    Hr, Wr = int(round(H_in * f)), int(round(W_in * f))
    wh_r = jnp.asarray(_resize_crop_matrix(H_in, Hr, Ht_t))
    ww_r = jnp.asarray(_resize_crop_matrix(W_in, Wr, Wt_t))
    img_r = jnp.transpose(x[:, :, ::-1], (2, 0, 1))             # swapRB, CHW
    ref_blob = (jnp.einsum("th,chw,vw->ctv", wh_r, img_r, ww_r) / 255.0)[None]
    ref_feat = jax.lax.conv_general_dilated(
        jnp.transpose(ref_blob, (0, 2, 3, 1)), params["w"], (1, 1), "SAME",
        dimension_numbers=("NHWC", "HWIO", "NHWC"))
    ref_feat = ref_feat * params["bn_scale"] + params["bn_bias"]
    ref_feat = jnp.where(ref_feat > 0, ref_feat, 0.1 * ref_feat)

    assert jnp.allclose(blob, ref_blob, atol=2e-2, rtol=2e-2)
    assert jnp.allclose(feat, ref_feat, atol=2e-2, rtol=2e-2)
    print("KERNEL_OK")
</pallas_src>

<mosaic_0001>
module attributes {stable_mosaic.version = 11 : i64} {
  func.func @_blob_kernel(%arg0: i32, %arg1: memref<16x20xf32, #tpu.memory_space<vmem>>, %arg2: memref<20x384xf32, #tpu.memory_space<vmem>>, %arg3: memref<128x16xf32, #tpu.memory_space<vmem>>, %arg4: memref<3x16x16xf32, #tpu.memory_space<vmem>>) attributes {dimension_semantics = [#tpu.dimension_semantics<parallel>], iteration_bounds = array<i64: 1>, scalar_prefetch = 0 : i64, scratch_operands = 0 : i64, tpu.core_type = #tpu.core_type<tc>, window_params = [{transform_indices = @transform_0, window_bounds = array<i64: 16, 20>}, {pipeline_mode = #tpu.pipeline_mode<synchronous>, transform_indices = @transform_1, window_bounds = array<i64: 20, 384>}, {pipeline_mode = #tpu.pipeline_mode<synchronous>, transform_indices = @transform_2, window_bounds = array<i64: 128, 16>}, {transform_indices = @transform_3, window_bounds = array<i64: 3, 16, 16>}]} {
    %c0 = arith.constant 0 : index
    %c0_0 = arith.constant 0 : index
    %0 = vector.load %arg1[%c0, %c0_0] : memref<16x20xf32, #tpu.memory_space<vmem>>, vector<16x20xf32>
    %c0_1 = arith.constant 0 : index
    %c0_2 = arith.constant 0 : index
    %1 = vector.load %arg2[%c0_1, %c0_2] : memref<20x384xf32, #tpu.memory_space<vmem>>, vector<20x384xf32>
    %cst = arith.constant dense<0.000000e+00> : vector<16x384xf32>
    %2 = tpu.matmul %0, %1, %cst {dimension_numbers = #tpu.dot_dimension_numbers<[1], [0], [0], [1], [0, 0, 1, 1], [], []>} : vector<16x20xf32>, vector<20x384xf32>, vector<16x384xf32> -> vector<16x384xf32>
    %3 = vector.extract_strided_slice %2 {offsets = [0, 0], sizes = [16, 128], strides = [1, 1]} : vector<16x384xf32> to vector<16x128xf32>
    %c0_3 = arith.constant 0 : index
    %c0_4 = arith.constant 0 : index
    %4 = vector.load %arg3[%c0_3, %c0_4] : memref<128x16xf32, #tpu.memory_space<vmem>>, vector<128x16xf32>
    %cst_5 = arith.constant dense<0.000000e+00> : vector<16x16xf32>
    %5 = tpu.matmul %3, %4, %cst_5 {dimension_numbers = #tpu.dot_dimension_numbers<[1], [0], [0], [1], [0, 0, 1, 1], [], []>} : vector<16x128xf32>, vector<128x16xf32>, vector<16x16xf32> -> vector<16x16xf32>
    %c0_6 = arith.constant 0 : index
    %c0_7 = arith.constant 0 : index
    %c0_8 = arith.constant 0 : index
    %6 = vector.load %arg4[%c0_6, %c0_7, %c0_8] : memref<3x16x16xf32, #tpu.memory_space<vmem>>, vector<1x16x16xf32>
    %7 = vector.shape_cast %6 : vector<1x16x16xf32> to vector<16x16xf32>
    %8 = vector.shape_cast %5 : vector<16x16xf32> to vector<1x16x16xf32>
    tpu.vector_store %arg4[%c0_6, %c0_7, %c0_8], %8 {strides = array<i32>} : memref<3x16x16xf32, #tpu.memory_space<vmem>>, vector<1x16x16xf32>,
    %9 = vector.extract_strided_slice %2 {offsets = [0, 128], sizes = [16, 128], strides = [1, 1]} : vector<16x384xf32> to vector<16x128xf32>
    %c0_9 = arith.constant 0 : index
    %c0_10 = arith.constant 0 : index
    %10 = vector.load %arg3[%c0_9, %c0_10] : memref<128x16xf32, #tpu.memory_space<vmem>>, vector<128x16xf32>
    %cst_11 = arith.constant dense<0.000000e+00> : vector<16x16xf32>
    %11 = tpu.matmul %9, %10, %cst_11 {dimension_numbers = #tpu.dot_dimension_numbers<[1], [0], [0], [1], [0, 0, 1, 1], [], []>} : vector<16x128xf32>, vector<128x16xf32>, vector<16x16xf32> -> vector<16x16xf32>
    %c1 = arith.constant 1 : index
    %c0_12 = arith.constant 0 : index
    %c0_13 = arith.constant 0 : index
    %12 = vector.load %arg4[%c1, %c0_12, %c0_13] : memref<3x16x16xf32, #tpu.memory_space<vmem>>, vector<1x16x16xf32>
    %13 = vector.shape_cast %12 : vector<1x16x16xf32> to vector<16x16xf32>
    %14 = vector.shape_cast %11 : vector<16x16xf32> to vector<1x16x16xf32>
    tpu.vector_store %arg4[%c1, %c0_12, %c0_13], %14 {strides = array<i32>} : memref<3x16x16xf32, #tpu.memory_space<vmem>>, vector<1x16x16xf32>,
    %15 = vector.extract_strided_slice %2 {offsets = [0, 256], sizes = [16, 128], strides = [1, 1]} : vector<16x384xf32> to vector<16x128xf32>
    %c0_14 = arith.constant 0 : index
    %c0_15 = arith.constant 0 : index
    %16 = vector.load %arg3[%c0_14, %c0_15] : memref<128x16xf32, #tpu.memory_space<vmem>>, vector<128x16xf32>
    %cst_16 = arith.constant dense<0.000000e+00> : vector<16x16xf32>
    %17 = tpu.matmul %15, %16, %cst_16 {dimension_numbers = #tpu.dot_dimension_numbers<[1], [0], [0], [1], [0, 0, 1, 1], [], []>} : vector<16x128xf32>, vector<128x16xf32>, vector<16x16xf32> -> vector<16x16xf32>
    %c2 = arith.constant 2 : index
    %c0_17 = arith.constant 0 : index
    %c0_18 = arith.constant 0 : index
    %18 = vector.load %arg4[%c2, %c0_17, %c0_18] : memref<3x16x16xf32, #tpu.memory_space<vmem>>, vector<1x16x16xf32>
    %19 = vector.shape_cast %18 : vector<1x16x16xf32> to vector<16x16xf32>
    %20 = vector.shape_cast %17 : vector<16x16xf32> to vector<1x16x16xf32>
    tpu.vector_store %arg4[%c2, %c0_17, %c0_18], %20 {strides = array<i32>} : memref<3x16x16xf32, #tpu.memory_space<vmem>>, vector<1x16x16xf32>,
    return
  }
  func.func @transform_0(%arg0: i32) -> (i32, i32) {
    %c0_i32 = arith.constant 0 : i32
    %c0_i32_0 = arith.constant 0 : i32
    return %arg0, %c0_i32 : i32, i32
  }
  func.func @transform_1(%arg0: i32) -> (i32, i32) {
    %c0_i32 = arith.constant 0 : i32
    %c0_i32_0 = arith.constant 0 : i32
    %c0_i32_1 = arith.constant 0 : i32
    return %c0_i32, %c0_i32_0 : i32, i32
  }
  func.func @transform_2(%arg0: i32) -> (i32, i32) {
    %c0_i32 = arith.constant 0 : i32
    %c0_i32_0 = arith.constant 0 : i32
    %c0_i32_1 = arith.constant 0 : i32
    return %c0_i32, %c0_i32_0 : i32, i32
  }
  func.func @transform_3(%arg0: i32) -> (i32, i32, i32) {
    %c0_i32 = arith.constant 0 : i32
    %c0_i32_0 = arith.constant 0 : i32
    %c0_i32_1 = arith.constant 0 : i32
    return %c0_i32, %arg0, %c0_i32_0 : i32, i32, i32
  }
}

</mosaic_0001>

<bundles_post_ra>
// kernel: tpu_custom_call.1
= control target key start
LH: loop header
LB: loop body
LE: loop exit
PB: predicated region body
PF: predicated region fallthrough
CT: control target
= control target key end

     0   :  { %v805_v5 = vmov 0.0   ;;  %vm33_vm0 = vcmask 1043456   ;;  %vm26_vm1 = vcmask 162816   ;;  %s954_s0 = inlined_call_operand.vmem [shape: f32[16,20], index: 0, kind: input, shape index: {}]   ;;  %s955_s1 = inlined_call_operand.vmem [shape: f32[20,384], index: 1, kind: input, shape index: {}]   ;;  %s956_s2 = inlined_call_operand.vmem [shape: f32[128,16], index: 2, kind: input, shape index: {}]   ;;  %s957_s3 = inlined_call_operand.hbm [shape: f32[3,16,16], index: 3, kind: output, shape index: {}]  }
   0x1   :  { %v18_v0 = vld [vmem:[%s955_s1 + $0x8] sm:$0xff]  ;;  %v21_v1 = vld [vmem:[%s955_s1 + $0x20] sm:$0xff]  ;;  %v20_v4 = vld [vmem:[%s955_s1 + $0x18] sm:$0xff]  ;;  %107 = vmatprep.mubr.f32.mxu1 %v805_v5 }
   0x2   :  { %v17_v2 = vld [vmem:[%s955_s1] sm:$0xff]  ;;  %v673_v3 = vpack.c.bf16 %v21_v1, %v18_v0  ;;  %v24_v7 = vld [vmem:[%s955_s1 + $0x38] sm:$0xf]  ;;  %v19_v8 = vld [vmem:[%s955_s1 + $0x10] sm:$0xff] }
   0x3   :  { %v675_v6 = vpack.c.bf16 %v20_v4, %v17_v2  ;;  %v22_v9 = vld [vmem:[%s955_s1 + $0x28] sm:$0xff]  ;;  %v195_v10 = vld [vmem:[%s956_s2] sm:$0xff]  ;;  %v197_v12 = vld [vmem:[%s956_s2 + $0x10] sm:$0xff] }
   0x4   :  { %674 = vmatprep.subr.bf16.mxu1 %v673_v3  ;;  %v196_v11 = vld [vmem:[%s956_s2 + $0x8] sm:$0xff]  ;;  %v198_v13 = vld [vmem:[%s956_s2 + $0x18] sm:$0xff]  ;;  %v23_v14 = vld [vmem:[%s955_s1 + $0x30] sm:$0xf]  ;;  %v677_v15 = vpack.c.bf16 %v22_v9, %v19_v8 }
   0x5   :  { %676 = vmatpush1.bf16.msra.mxu1 %v675_v6  ;;  %v866_v16 = vpack.c.bf16 %v196_v11, %v195_v10  ;;  %v15_v17 = vld [vmem:[%s954_s0] sm:$0xff]  ;;  %v200_v19 = vld [vmem:[%s956_s2 + $0x28] sm:$0xff]  ;;  %v878_v20 = vpack.c.bf16 %v198_v13, %v197_v12 }
   0x6   :  { %493 = vmatprep.subr.msk.mxu1 %vm33_vm0, %v24_v7  ;;  %v199_v18 = vld [vmem:[%s956_s2 + $0x20] sm:$0xff] }
   0x7   :  { %682 = vmatprep.subr.bf16.mxu0 %v866_v16  ;;  %v25_v21 = vld [vmem:[%s955_s1 + $0x40] sm:$0xf] }
   0x8   :  { %684 = vmatpush3.bf16.msra.mxu0 %v866_v16 }
   0x9   :  { %494 = vmatpush1.msk.msra.mxu1 %vm33_vm0, %v23_v14 }
   0xa   :  { %8 = vsyncpa [#allocation3], 0  ;;  %495 = vmatmul.mubr.msk.f32.vlgmr.msra.gmra.mrb[0].mxu1 %vm26_vm1, %v15_v17  ;;  %678 = vmatprep.subr.bf16.mxu1 %v677_v15  ;;  %v886_v22 = vpack.c.bf16 %v200_v19, %v199_v18  ;;  %v16_v23 = vld [vmem:[%s954_s0 + $0x8] sm:$0xff]  ;;  %v201_v24 = vld [vmem:[%s956_s2 + $0x30] sm:$0xff]  ;;  %vm286_vm2 = vcmask 130048  }
   0xb   :  { %113 = vmatprep.mubr.f32.mxu1 %v805_v5  ;;  %680 = vmatpush3.bf16.msra.mxu1 %v677_v15  ;;  %v202_v25 = vld [vmem:[%s956_s2 + $0x38] sm:$0xff]  ;;  %v203_v27 = vld [vmem:[%s956_s2 + $0x40] sm:$0xff]  ;;  %v204_v28 = vld [vmem:[%s956_s2 + $0x48] sm:$0xff] }
   0xc   :  { %563 = vmatprep.subr.msk.mxu1 %vm33_vm0, %v25_v21  ;;  %686 = vmatprep.subr.bf16.mxu0 %v878_v20  ;;  %v693_v26 = vpack.c.bf16 %v202_v25, %v201_v24  ;;  %v697_v29 = vpack.c.bf16 %v204_v28, %v203_v27  ;;  %v205_v30 = vld [vmem:[%s956_s2 + $0x50] sm:$0xff]  ;;  %v206_v31 = vld [vmem:[%s956_s2 + $0x58] sm:$0xff]  ;;  %v207_v33 = vld [vmem:[%s956_s2 + $0x60] sm:$0xff] }
   0xd   :  { %688 = vmatpush3.bf16.msra.mxu0 %v878_v20  ;;  %v701_v32 = vpack.c.bf16 %v206_v31, %v205_v30  ;;  %v208_v34 = vld [vmem:[%s956_s2 + $0x68] sm:$0xff]  ;;  %v209_v36 = vld [vmem:[%s956_s2 + $0x70] sm:$0xff]  ;;  %v210_v37 = vld [vmem:[%s956_s2 + $0x78] sm:$0xff]  ;;  %s806_s2 = smov [#allocation2]  }
   0xe   :  { %496 = vmatmul.mubr.msk.f32.gmra.mrb[2].mxu1 %vm26_vm1, %v16_v23  ;;  %690 = vmatprep.subr.bf16.mxu0 %v886_v22  ;;  %v705_v35 = vpack.c.bf16 %v208_v34, %v207_v33  ;;  %v709_v38 = vpack.c.bf16 %v210_v37, %v209_v36  ;;  %s482_s10 = sshll.u32 %s806_s2, 4  ;;  %s483_s10 = int_to_ptr.vmem [resolvable:$true] %s482_s10 }
   0xf   :  { %564 = vmatpush3.msk.msra.mxu1 %vm33_vm0, %v25_v21  ;;  %565 = vmatprep.mubr.msk.f32.mxu1 %vm26_vm1, %v15_v17  ;;  %s781_s11 = scalar_lea.vmem %s483_s10, 768  ;;  %p786_p1 = scmp.lt.s32.totalorder %s483_s10, %s483_s10 }
  0x10   :  { %714 = vmatprep.subr.bf16.mxu1 %v866_v16  ;;  %p782_p0 = scmp.ne.s32.totalorder %s483_s10, %s781_s11  ;;  %p787_p2 = scmp.lt.s32.totalorder %s781_s11, %s781_s11 }
  0x11   :  { %692 = vmatpush3.bf16.msra.mxu0 %v886_v22 }
  0x12   :  { %566 = vmatmul.mubr.msk.f32.vlgmr.msra.gmra.mrb[4].mxu1 %vm26_vm1, %v16_v23  ;;  %694 = vmatprep.subr.bf16.mxu0 %v693_v26  ;;  %p788_p3 = por %p787_p2, %p786_p1 }
  0x13   :  { %716 = vmatpush3.bf16.msra.mxu1 %v866_v16 }
  0x14   :  { %718 = vmatprep.subr.bf16.mxu1 %v878_v20  ;;  %p789_p4 = pnand %p788_p3, %p782_p0 }
  0x15   :  { %696 = vmatpush3.bf16.msra.mxu0 %v693_v26 }
  0x16   :  { %698 = vmatprep.subr.bf16.mxu0 %v697_v29 }
  0x17   :  { %720 = vmatpush3.bf16.msra.mxu1 %v878_v20 }
  0x18   :  { %722 = vmatprep.subr.bf16.mxu1 %v886_v22 }
  0x19   :  { %700 = vmatpush3.bf16.msra.mxu0 %v697_v29 }
  0x1a   :  { %702 = vmatprep.subr.bf16.mxu0 %v701_v32 }
  0x1b   :  { %724 = vmatpush3.bf16.msra.mxu1 %v886_v22 }
  0x1c   :  { %726 = vmatprep.subr.bf16.mxu1 %v693_v26 }
  0x1d   :  { %704 = vmatpush3.bf16.msra.mxu0 %v701_v32 }
  0x1e   :  { %706 = vmatprep.subr.bf16.mxu0 %v705_v35 }
  0x1f   :  { %728 = vmatpush3.bf16.msra.mxu1 %v693_v26 }
  0x20   :  { %730 = vmatprep.subr.bf16.mxu1 %v697_v29 }
  0x21   :  { %708 = vmatpush3.bf16.msra.mxu0 %v705_v35 }
  0x22   :  { %710 = vmatprep.subr.bf16.mxu0 %v709_v38 }
  0x23   :  { %732 = vmatpush3.bf16.msra.mxu1 %v697_v29 }
  0x24   :  { %734 = vmatprep.subr.bf16.mxu1 %v701_v32 }
  0x25   :  { %712 = vmatpush3.bf16.msra.mxu0 %v709_v38 }
  0x26   :  { %746 = vmatprep.subr.bf16.mxu0 %v866_v16 }
  0x27   :  { %736 = vmatpush3.bf16.msra.mxu1 %v701_v32 }
  0x28   :  { %738 = vmatprep.subr.bf16.mxu1 %v705_v35 }
  0x2b   :  { %740 = vmatpush3.bf16.msra.mxu1 %v705_v35 }
  0x2c   :  { %742 = vmatprep.subr.bf16.mxu1 %v709_v38 }
  0x2f   :  { %744 = vmatpush3.bf16.msra.mxu1 %v709_v38 }
  0xdd   :  { %v109_v39 = vpop.f32.mrb[0].mxu1 }
  0xde   :  { %v111_v40 = vpop.f32.mrb[1].mxu1  ;;  %600 = vmatprep.mubr.f32.mxu0 %v109_v39 }
  0xdf   :  { %635 = vmatprep.mubr.f32.mxu1 %v111_v40 }
  0xe1   :  { %v115_v41 = vpop.f32.mrb[2].mxu1 }
  0xe2   :  { %v117_v42 = vpop.f32.mrb[3].mxu1  ;;  %601 = vmatmul.mubr.f32.vlgmr.msra.gmra.mrb[0].mxu0 %v115_v41 }
  0xe3   :  { %748 = vmatpush3.bf16.msra.mxu0 %v866_v16  ;;  %636 = vmatmul.mubr.f32.vlgmr.msra.gmra.mrb[6].mxu1 %v117_v42 }
  0xe4   :  { %750 = vmatprep.subr.bf16.mxu0 %v878_v20 }
  0xe5   :  { %v567_v43 = vpop.f32.mrb[4].mxu1 }
  0xe6   :  { %v186_v44 = vpop.f32.mrb[5].mxu1 }
  0xe7   :  { %752 = vmatpush3.bf16.msra.mxu0 %v878_v20  ;;  %670 = vmatprep.mubr.f32.mxu0 %v186_v44 }
  0xe8   :  { %754 = vmatprep.subr.bf16.mxu0 %v886_v22 }
  0xeb   :  { %756 = vmatpush3.bf16.msra.mxu0 %v886_v22 }
  0xec   :  { %758 = vmatprep.subr.bf16.mxu0 %v693_v26 }
  0xef   :  { %760 = vmatpush3.bf16.msra.mxu0 %v693_v26 }
  0xf0   :  { %762 = vmatprep.subr.bf16.mxu0 %v697_v29 }
  0xf3   :  { %764 = vmatpush3.bf16.msra.mxu0 %v697_v29 }
  0xf4   :  { %766 = vmatprep.subr.bf16.mxu0 %v701_v32 }
  0xf7   :  { %768 = vmatpush3.bf16.msra.mxu0 %v701_v32 }
  0xf8   :  { %770 = vmatprep.subr.bf16.mxu0 %v705_v35 }
  0xfb   :  { %772 = vmatpush3.bf16.msra.mxu0 %v705_v35 }
  0xfc   :  { %774 = vmatprep.subr.bf16.mxu0 %v709_v38 }
  0xff   :  { %776 = vmatpush3.bf16.msra.mxu0 %v709_v38 }
 0x102   :  { %671 = vmatmul.mubr.f32.vlgmr.msra.gmra.mrb[2].mxu0 %v567_v43 }
 0x1b5   :  { %v602_v45 = vpop.f32.mrb[0].mxu0 }
 0x1b6   :  { %288 = vst.msk [vmem:[#allocation2 + $0x8] sm:$0xff] %vm286_vm2, %v602_v45  ;;  %v277_v46 = vpop.f32.mrb[1].mxu0  ;;  %v637_v47 = vpop.f32.mrb[6].mxu1 }
 0x1b7   :  { %287 = vst.msk [vmem:[#allocation2] sm:$0xff] %vm286_vm2, %v277_v46  ;;  %382 = vst.msk [vmem:[#allocation2 + $0x18] sm:$0xff] %vm286_vm2, %v637_v47  ;;  %v371_v48 = vpop.f32.mrb[7].mxu1 }
 0x1b8   :  { %381 = vst.msk [vmem:[#allocation2 + $0x10] sm:$0xff] %vm286_vm2, %v371_v48 }
 0x1d5   :  { %v672_v49 = vpop.f32.mrb[2].mxu0 }
 0x1d6   :  { %476 = vst.msk [vmem:[#allocation2 + $0x28] sm:$0xff] %vm286_vm2, %v672_v49  ;;  %v465_v50 = vpop.f32.mrb[3].mxu0 }
 0x1d7   :  { %475 = vst.msk [vmem:[#allocation2 + $0x20] sm:$0xff] %vm286_vm2, %v465_v50 }
 0x1d8   :  { %792 = shalt.err (!%p789_p4)
}
 0x1d9   :  { %s793_s14 = scalar_lea.hbm %s957_s3, 768 }
 0x1da   :  { %p794_p5 = scmp.ne.s32.totalorder %s957_s3, %s793_s14  ;;  %p797_p6 = scmp.lt.u32.totalorder %s793_s14, %s957_s3 }
 0x1dc   :  { %p799_p7 = pnand %p797_p6, %p794_p5 }
 0x1de   :  { %802 = shalt.err (!%p799_p7)
}
 0x1df   :  { %s807_s19 = smov 128   ;;  %s808_s20 = smov 8  }
 0x1e0   :  { %488 = dma.vmem_to_hbm [thread:$0]  %s483_s10, 768, %s957_s3, [#allocation3], %s807_s19, %s807_s19, %s808_s20  }
 0x1e1   :  { %803 = dma.done.wait [#allocation3], 768  }
 0x1e2   :  { %804 = vsyncadd [#allocation3], 4294966528 }
 0x1e3   :  { %492 = vsyncpa [#allocation3], 1 }

</bundles_post_ra>
